<compile_context>
chip_gen: v5e
topology: v5e:2x2
jax: 0.10.0
libtpu: 0.0.40
codegen_flags: <defaults>
</compile_context>

<pallas_src>
import functools

import jax
import jax.numpy as jnp
from jax.experimental import pallas as pl
from jax.experimental.pallas import tpu as pltpu


_LANE = 128
_ONEHOT_MAX_VOCAB = 512      # use the MXU one-hot gather up to this vocab size
_MAX_SEQ_TILE = 512          # multiple of 128
_TARGET_BLOCK_BYTES = 4 << 20


def _round_up(x, m):
    return ((x + m - 1) // m) * m


def _vmem_capacity_bytes():
    """Per-core VMEM capacity (128 MiB on v5e/v6e, 64 MiB on v7x)."""
    try:
        info = pltpu.get_tpu_info()
        cap = int(getattr(info, "vmem_capacity_bytes", 0))
        if cap > 0:
            return cap
    except Exception:   # info query is best-effort
        pass
    return 64 * 1024 * 1024   # conservative default (v7x per-TC size)


def _choose_tiles(batch, seq, e_pad, out_itemsize, extra_row_bytes):
    """Pick (seq_tile, batch_block).

    seq_tile: full sequence when small, else a multiple of 128 (keeps the ids
    VMEM block layout-legal and all tiles lane/sublane aligned).
    batch_block: full batch when <= 8, else a multiple of 8, sized so one
    output block plus its per-row temporaries is a few MiB.
    """
    seq_tile = seq if seq <= _MAX_SEQ_TILE else _MAX_SEQ_TILE
    row_bytes = seq_tile * (e_pad * out_itemsize + extra_row_bytes)
    cap = max(1, _TARGET_BLOCK_BYTES // max(1, row_bytes))
    if batch <= 8 or cap >= batch:
        batch_block = batch
    else:
        batch_block = max(8, (min(cap, batch) // 8) * 8)
    return seq_tile, batch_block


def _onehot_embed_kernel(ids_ref, tok_ref, pos_ref, out_ref, *,
                         vocab_size, batch_block):
    """Row gather via a one-hot MXU matmul (small vocab): (TS,V) @ (V,Ep)."""
    # ids_ref: (Bblk, TS) int32 VMEM | tok_ref: (V, Ep) resident VMEM
    # pos_ref: (TS, Ep)              | out_ref: (Bblk, TS, Ep)
    table = tok_ref[...]
    pos = pos_ref[...].astype(jnp.float32)
    iota_v = jax.lax.broadcasted_iota(jnp.int32, (1, vocab_size), 1)
    for b in range(batch_block):                                     # static, small
        ids_b = jnp.clip(ids_ref[b], 0, vocab_size - 1)              # (TS,)
        onehot = (ids_b[:, None] == iota_v).astype(table.dtype)      # (TS, V)
        rows = jnp.dot(onehot, table, preferred_element_type=jnp.float32)
        out_ref[b, :, :] = (rows + pos).astype(out_ref.dtype)


def _rowgather_embed_kernel(ids_ref, tok_ref, pos_ref, out_ref, gather_ref, *,
                            vocab_size, batch_block, seq_tile):
    """Row gather via per-row dynamic-slice copies from the resident table."""
    # ids_ref: (Bblk, TS) int32 SMEM | gather_ref: (Bblk, TS, Ep) VMEM scratch
    def copy_row(b, r):
        tid = jnp.clip(ids_ref[b, r], 0, vocab_size - 1)   # OOB-id / tail safety
        gather_ref[b, pl.ds(r, 1), :] = tok_ref[pl.ds(tid, 1), :]

    if seq_tile <= 64:
        for b in range(batch_block):
            for r in range(seq_tile):
                copy_row(b, r)
    else:
        for b in range(batch_block):
            def body(r, carry, b=b):
                copy_row(b, r)
                return carry
            jax.lax.fori_loop(0, seq_tile, body, 0, unroll=8)

    out_ref[...] = (gather_ref[...] + pos_ref[...][None, :, :]).astype(out_ref.dtype)


def input_embedding(ids, token_table, pos_table):
    """InputEmbedding.forward: token_table[ids] + pos_table[:S] (broadcast over batch)."""
    batch, seq = ids.shape
    vocab, embed = token_table.shape
    max_seq_len = pos_table.shape[0]
    # Mirrors the PyTorch range check on positions.
    if seq > max_seq_len:
        raise ValueError(
            "Position index out of range: Max position should be less than "
            f"{max_seq_len}")

    out_dtype = token_table.dtype
    tok_isz = jnp.dtype(out_dtype).itemsize
    e_pad = _round_up(embed, _LANE)

    ids32 = ids.astype(jnp.int32)
    tok = token_table if e_pad == embed else jnp.pad(
        token_table, ((0, 0), (0, e_pad - embed)))
    pos = pos_table[:seq].astype(out_dtype)
    if e_pad != embed:
        pos = jnp.pad(pos, ((0, 0), (0, e_pad - embed)))

    use_onehot = vocab <= _ONEHOT_MAX_VOCAB
    if use_onehot:
        extra_row_bytes = vocab * tok_isz + e_pad * 4     # one-hot temp + f32 acc
    else:
        extra_row_bytes = e_pad * tok_isz                 # gathered-rows scratch
    seq_tile, batch_block = _choose_tiles(batch, seq, e_pad, tok_isz, extra_row_bytes)

    num_s = pl.cdiv(seq, seq_tile)
    num_b = pl.cdiv(batch, batch_block)

    # ---- VMEM budget (token table resident & single-buffered) ----
    vmem_needed = (
        vocab * e_pad * tok_isz                              # resident table (Buffered(1))
        + 2 * seq_tile * e_pad * tok_isz                     # pos tile (double-buffered)
        + 2 * batch_block * seq_tile * e_pad * tok_isz       # out tile (double-buffered)
        + 2 * batch_block * seq_tile * 4                     # ids tile
        + 2 * batch_block * seq_tile * extra_row_bytes       # in-kernel temporaries
        + (2 << 20))                                         # slack
    capacity = _vmem_capacity_bytes()
    budget = capacity - (16 << 20)                           # headroom for Mosaic internals
    if vmem_needed > budget:
        # TODO(synk): large-vocab path -- keep the table in HBM (memory_space=pl.ANY)
        # and row-gather with double-buffered pltpu.make_async_copy DMAs instead of
        # this plain-JAX fallback (which is the only piece not done in Pallas).
        rows = jnp.take(token_table, jnp.clip(ids32, 0, vocab - 1), axis=0)
        return (rows + pos_table[:seq][None, :, :]).astype(out_dtype)

    vmem_limit = int(min(budget, max(int(vmem_needed * 1.25), 32 << 20)))

    # ---- block specs ----
    # Resident token table: constant block index, single-buffered (no waste).
    tok_spec = pl.BlockSpec((vocab, e_pad), lambda s, b: (0, 0),
                            pipeline_mode=pl.Buffered(1))
    # Positional rows depend only on the OUTER (seq) grid axis, so they are not
    # re-fetched across the inner batch steps.
    pos_spec = pl.BlockSpec((seq_tile, e_pad), lambda s, b: (s, 0))
    out_spec = pl.BlockSpec((batch_block, seq_tile, e_pad), lambda s, b: (b, s, 0))

    if use_onehot:
        kernel = functools.partial(_onehot_embed_kernel, vocab_size=vocab,
                                   batch_block=batch_block)
        ids_spec = pl.BlockSpec((batch_block, seq_tile), lambda s, b: (b, s))
        scratch = []
        flops = 2 * batch * seq * vocab * e_pad + batch * seq * e_pad
    else:
        kernel = functools.partial(_rowgather_embed_kernel, vocab_size=vocab,
                                   batch_block=batch_block, seq_tile=seq_tile)
        ids_spec = pl.BlockSpec((batch_block, seq_tile), lambda s, b: (b, s),
                                memory_space=pltpu.SMEM)
        scratch = [pltpu.VMEM((batch_block, seq_tile, e_pad), out_dtype)]
        flops = batch * seq * e_pad

    bytes_accessed = (batch * seq * 4                        # ids
                      + vocab * e_pad * tok_isz              # table (read once)
                      + seq * e_pad * tok_isz                # positional rows
                      + batch * seq * e_pad * tok_isz)       # output

    grid_spec = pltpu.PrefetchScalarGridSpec(
        num_scalar_prefetch=0,
        grid=(num_s, num_b),            # seq tiles OUTER, batch blocks INNER
        in_specs=[ids_spec, tok_spec, pos_spec],
        out_specs=out_spec,
        scratch_shapes=scratch,
    )

    out = pl.pallas_call(
        kernel,
        out_shape=jax.ShapeDtypeStruct((batch, seq, e_pad), out_dtype),
        grid_spec=grid_spec,
        compiler_params=pltpu.CompilerParams(
            # Both axes independent. NOTE (v7x): with 2 TensorCores this
            # replicates the resident table per core; acceptable for tables
            # small enough to pass the VMEM budget check above.
            dimension_semantics=("parallel", "parallel"),
            vmem_limit_bytes=vmem_limit,
        ),
        cost_estimate=pl.CostEstimate(flops=int(flops), transcendentals=0,
                                      bytes_accessed=int(bytes_accessed)),
    )(ids32, tok, pos)

    return out if e_pad == embed else out[..., :embed]


if __name__ == "__main__":
    # Small, deterministic shapes consistent with the module (embed_dim = 216
    # from the original file); scaled-down vocab / seq / batch for the demo.
    vocab_size, embed_dim, max_seq_len = 50, 216, 32
    batch_size, seq_len = 2, 16

    key = jax.random.PRNGKey(0)
    k_tok, k_pos, k_ids, k_tok2, k_ids2 = jax.random.split(key, 5)
    token_table = jax.random.normal(k_tok, (vocab_size, embed_dim), jnp.float32)
    pos_table = jax.random.normal(k_pos, (max_seq_len, embed_dim), jnp.float32)
    ids = jax.random.randint(k_ids, (batch_size, seq_len), 0, vocab_size, jnp.int32)

    # Main run (small vocab -> MXU one-hot gather path).
    out = jax.block_until_ready(input_embedding(ids, token_table, pos_table))
    ref = token_table[ids] + pos_table[:seq_len][None, :, :]
    assert out.shape == (batch_size, seq_len, embed_dim)
    # Tolerance covers the MXU's reduced-precision f32 passes on the one-hot matmul.
    assert jnp.allclose(out, ref, atol=2e-2, rtol=2e-2), "one-hot path mismatch"

    # Also exercise the row-gather path (vocab above the one-hot threshold).
    big_vocab = 600
    token_table2 = jax.random.normal(k_tok2, (big_vocab, embed_dim), jnp.float32)
    ids2 = jax.random.randint(k_ids2, (batch_size, seq_len), 0, big_vocab, jnp.int32)
    out2 = jax.block_until_ready(input_embedding(ids2, token_table2, pos_table))
    ref2 = token_table2[ids2] + pos_table[:seq_len][None, :, :]
    assert jnp.allclose(out2, ref2, atol=1e-6), "row-gather path mismatch"

    print("KERNEL_OK")
</pallas_src>

<mosaic_0001>
module attributes {stable_mosaic.version = 11 : i64} {
  func.func @_onehot_embed_kernel(%arg0: i32, %arg1: i32, %arg2: memref<2x16xi32, #tpu.memory_space<vmem>>, %arg3: memref<50x256xf32, #tpu.memory_space<vmem>>, %arg4: memref<16x256xf32, #tpu.memory_space<vmem>>, %arg5: memref<2x16x256xf32, #tpu.memory_space<vmem>>) attributes {dimension_semantics = [#tpu.dimension_semantics<parallel>, #tpu.dimension_semantics<parallel>], iteration_bounds = array<i64: 1, 1>, scalar_prefetch = 0 : i64, scratch_operands = 0 : i64, tpu.core_type = #tpu.core_type<tc>, window_params = [{transform_indices = @transform_0, window_bounds = array<i64: 2, 16>}, {pipeline_mode = #tpu.pipeline_mode<synchronous>, transform_indices = @transform_1, window_bounds = array<i64: 50, 256>}, {transform_indices = @transform_2, window_bounds = array<i64: 16, 256>}, {transform_indices = @transform_3, window_bounds = array<i64: 2, 16, 256>}]} {
    %c0 = arith.constant 0 : index
    %c0_0 = arith.constant 0 : index
    %0 = vector.load %arg3[%c0, %c0_0] : memref<50x256xf32, #tpu.memory_space<vmem>>, vector<50x256xf32>
    %c0_1 = arith.constant 0 : index
    %c0_2 = arith.constant 0 : index
    %1 = vector.load %arg4[%c0_1, %c0_2] : memref<16x256xf32, #tpu.memory_space<vmem>>, vector<16x256xf32>
    %2 = tpu.iota {dimensions = array<i32: 1>} : vector<1x50xi32>
    %c0_3 = arith.constant 0 : index
    %c0_4 = arith.constant 0 : index
    %3 = vector.load %arg2[%c0_3, %c0_4] : memref<2x16xi32, #tpu.memory_space<vmem>>, vector<1x16xi32>
    %4 = vector.shape_cast %3 : vector<1x16xi32> to vector<16xi32>
    %c0_i32 = arith.constant 0 : i32
    %c49_i32 = arith.constant 49 : i32
    %5 = vector.broadcast %c0_i32 : i32 to vector<16xi32>
    %6 = arith.maxsi %5, %4 : vector<16xi32>
    %7 = vector.broadcast %c49_i32 : i32 to vector<16xi32>
    %8 = arith.minsi %7, %6 : vector<16xi32>
    %9 = vector.shape_cast %8 : vector<16xi32> to vector<16x1xi32>
    %10 = vector.broadcast %9 : vector<16x1xi32> to vector<16x50xi32>
    %11 = vector.broadcast %2 : vector<1x50xi32> to vector<16x50xi32>
    %12 = arith.cmpi eq, %10, %11 : vector<16x50xi32>
    %13 = arith.extui %12 : vector<16x50xi1> to vector<16x50xi32>
    %14 = arith.sitofp %13 : vector<16x50xi32> to vector<16x50xf32>
    %cst = arith.constant dense<0.000000e+00> : vector<16x256xf32>
    %15 = tpu.matmul %14, %0, %cst {dimension_numbers = #tpu.dot_dimension_numbers<[1], [0], [0], [1], [0, 0, 1, 1], [], []>} : vector<16x50xf32>, vector<50x256xf32>, vector<16x256xf32> -> vector<16x256xf32>
    %16 = arith.addf %15, %1 : vector<16x256xf32>
    %c0_5 = arith.constant 0 : index
    %c0_6 = arith.constant 0 : index
    %c0_7 = arith.constant 0 : index
    %17 = vector.load %arg5[%c0_5, %c0_6, %c0_7] : memref<2x16x256xf32, #tpu.memory_space<vmem>>, vector<1x16x256xf32>
    %18 = vector.shape_cast %17 : vector<1x16x256xf32> to vector<16x256xf32>
    %19 = vector.shape_cast %16 : vector<16x256xf32> to vector<1x16x256xf32>
    tpu.vector_store %arg5[%c0_5, %c0_6, %c0_7], %19 {strides = array<i32>} : memref<2x16x256xf32, #tpu.memory_space<vmem>>, vector<1x16x256xf32>,
    %c1 = arith.constant 1 : index
    %c0_8 = arith.constant 0 : index
    %20 = vector.load %arg2[%c1, %c0_8] : memref<2x16xi32, #tpu.memory_space<vmem>>, vector<1x16xi32>
    %21 = vector.shape_cast %20 : vector<1x16xi32> to vector<16xi32>
    %c0_i32_9 = arith.constant 0 : i32
    %c49_i32_10 = arith.constant 49 : i32
    %22 = vector.broadcast %c0_i32_9 : i32 to vector<16xi32>
    %23 = arith.maxsi %22, %21 : vector<16xi32>
    %24 = vector.broadcast %c49_i32_10 : i32 to vector<16xi32>
    %25 = arith.minsi %24, %23 : vector<16xi32>
    %26 = vector.shape_cast %25 : vector<16xi32> to vector<16x1xi32>
    %27 = vector.broadcast %26 : vector<16x1xi32> to vector<16x50xi32>
    %28 = vector.broadcast %2 : vector<1x50xi32> to vector<16x50xi32>
    %29 = arith.cmpi eq, %27, %28 : vector<16x50xi32>
    %30 = arith.extui %29 : vector<16x50xi1> to vector<16x50xi32>
    %31 = arith.sitofp %30 : vector<16x50xi32> to vector<16x50xf32>
    %cst_11 = arith.constant dense<0.000000e+00> : vector<16x256xf32>
    %32 = tpu.matmul %31, %0, %cst_11 {dimension_numbers = #tpu.dot_dimension_numbers<[1], [0], [0], [1], [0, 0, 1, 1], [], []>} : vector<16x50xf32>, vector<50x256xf32>, vector<16x256xf32> -> vector<16x256xf32>
    %33 = arith.addf %32, %1 : vector<16x256xf32>
    %c1_12 = arith.constant 1 : index
    %c0_13 = arith.constant 0 : index
    %c0_14 = arith.constant 0 : index
    %34 = vector.load %arg5[%c1_12, %c0_13, %c0_14] : memref<2x16x256xf32, #tpu.memory_space<vmem>>, vector<1x16x256xf32>
    %35 = vector.shape_cast %34 : vector<1x16x256xf32> to vector<16x256xf32>
    %36 = vector.shape_cast %33 : vector<16x256xf32> to vector<1x16x256xf32>
    tpu.vector_store %arg5[%c1_12, %c0_13, %c0_14], %36 {strides = array<i32>} : memref<2x16x256xf32, #tpu.memory_space<vmem>>, vector<1x16x256xf32>,
    return
  }
  func.func @transform_0(%arg0: i32, %arg1: i32) -> (i32, i32) {
    %c0_i32 = arith.constant 0 : i32
    return %arg1, %arg0 : i32, i32
  }
  func.func @transform_1(%arg0: i32, %arg1: i32) -> (i32, i32) {
    %c0_i32 = arith.constant 0 : i32
    %c0_i32_0 = arith.constant 0 : i32
    %c0_i32_1 = arith.constant 0 : i32
    return %c0_i32, %c0_i32_0 : i32, i32
  }
  func.func @transform_2(%arg0: i32, %arg1: i32) -> (i32, i32) {
    %c0_i32 = arith.constant 0 : i32
    %c0_i32_0 = arith.constant 0 : i32
    return %arg0, %c0_i32 : i32, i32
  }
  func.func @transform_3(%arg0: i32, %arg1: i32) -> (i32, i32, i32) {
    %c0_i32 = arith.constant 0 : i32
    %c0_i32_0 = arith.constant 0 : i32
    return %arg1, %arg0, %c0_i32 : i32, i32, i32
  }
}

</mosaic_0001>

<bundles_post_ra>
// kernel: tpu_custom_call.1
= control target key start
LH: loop header
LB: loop body
LE: loop exit
PB: predicated region body
PF: predicated region fallthrough
CT: control target
= control target key end

     0   :  { %8 = vsyncpa [#allocation3], 0  ;;  %s459_s0 = inlined_call_operand.hbm [shape: s32[2,16], index: 0, kind: input, shape index: {}]   ;;  %s460_s1 = inlined_call_operand.hbm [shape: f32[50,256], index: 1, kind: input, shape index: {}]   ;;  %s461_s2 = inlined_call_operand.hbm [shape: f32[16,256], index: 2, kind: input, shape index: {}]   ;;  %s462_s3 = inlined_call_operand.hbm [shape: f32[2,16,256], index: 3, kind: output, shape index: {}]  }
   0x1   :  { %9 = vsyncpa [#allocation6], 0  ;;  %s26_s14 = sshll.u32 %s460_s1, 4  ;;  %s27_s14 = int_to_ptr.hbm [resolvable:$true] %s26_s14 }
   0x2   :  { %10 = vsyncpa [#allocation4], 0  ;;  %s397_s15 = smov [#allocation5]   ;;  %s16_s19 = sshll.u32 %s459_s0, 4  ;;  %s17_s19 = int_to_ptr.hbm [resolvable:$true] %s16_s19 }
   0x3   :  { %s28_s16 = sshll.u32 %s397_s15, 4  ;;  %s398_s20 = smov 256   ;;  %s29_s16 = int_to_ptr.vmem [resolvable:$true] %s28_s16 }
   0x4   :  { %s399_s21 = smov 16   ;;  %s400_s22 = smov [#allocation2]  }
   0x5   :  { %34 = dma.hbm_to_vmem [thread:$0]  %s27_s14, 1792, %s29_s16, [#allocation6], %s398_s20, %s398_s20, %s399_s21  }
   0x6   :  { %s18_s23 = sshll.u32 %s400_s22, 4  ;;  %s39_s25 = sshll.u32 %s461_s2, 4  ;;  %s19_s23 = int_to_ptr.vmem [resolvable:$true] %s18_s23  ;;  %s40_s25 = int_to_ptr.hbm [resolvable:$true] %s39_s25 }
   0x7   :  { %21 = dma.hbm_to_vmem [thread:$0]  %s17_s19, 32, %s19_s23, [#allocation3]  }
   0x8   :  { %s401_s26 = smov [#allocation7]  }
   0x9   :  { %s41_s27 = sshll.u32 %s401_s26, 4  ;;  %s42_s27 = int_to_ptr.vmem [resolvable:$true] %s41_s27 }
   0xa   :  { %47 = dma.hbm_to_vmem [thread:$0]  %s40_s25, 512, %s42_s27, [#allocation6], %s398_s20, %s398_s20, %s399_s21  }
   0xb   :  { %391 = dma.done.wait [#allocation3], 32  }
   0xc   :  { %392 = vsyncadd [#allocation3], 4294967264 }
   0xd   :  { %393 = dma.done.wait [#allocation6], 2304  }
   0xe   :  { %394 = vsyncadd [#allocation6], 4294964992  ;;  %v78_v0 = vlaneseq  ;;  %vm111_vm0 = vcmask 1041408   ;;  %v168_v3 = vld [vmem:[#allocation2 + $0x1] sm:$0x1]  ;;  %v70_v7 = vld [vmem:[#allocation5 + $0x50] sm:$0xff] }
   0xf   :  { %v80_v4 = vld [vmem:[#allocation2] sm:$0x1]  ;;  %v72_v5 = vld [vmem:[#allocation5 + $0x60] sm:$0x3]  ;;  %vm169_vm1 = vcmp.gt.s32.totalorder %v168_v3, 0  ;;  %v69_v12 = vld [vmem:[#allocation5 + $0x48] sm:$0xff] }
  0x10   :  { %v87_v1 = vshrl.u32 %v78_v0, 7  ;;  %vm81_vm2 = vcmp.gt.s32.totalorder %v80_v4, 0  ;;  %279 = vmatpush.msk.msra.mxu2 %vm111_vm0, %v72_v5  ;;  %v73_v6 = vld [vmem:[#allocation5 + $0x68] sm:$0x3]  ;;  %v71_v8 = vld [vmem:[#allocation5 + $0x58] sm:$0xff]  ;;  %271 = vmatpush.msk.msra.mxu0 %vm111_vm0, %v72_v5  ;;  %v170_v9 = vsel %vm169_vm1, %v168_v3, 0 }
  0x11   :  { %v82_v10 = vsel %vm81_vm2, %v80_v4, 0  ;;  %282 = vmatpush.msk.msra.mxu3 %vm111_vm0, %v73_v6  ;;  %v68_v11 = vld [vmem:[#allocation5 + $0x40] sm:$0xff]  ;;  %274 = vmatpush.msk.msra.mxu1 %vm111_vm0, %v73_v6  ;;  %vm171_vm3 = vcmp.lt.s32.totalorder %v170_v9, 49  ;;  %v66_v15 = vld [vmem:[#allocation5 + $0x30] sm:$0xff]  ;;  %v67_v16 = vld [vmem:[#allocation5 + $0x38] sm:$0xff]  ;;  %v79_v25 = vand.u32 127, %v78_v0 }
  0x12   :  { %292 = vset.pattern.permute.xlu0 %v87_v1  ;;  %v94_v2 = vadd.s32 8, %v87_v1  ;;  %208 = vmatpush.msra.mxu2 %v70_v7  ;;  %v172_v13 = vsel %vm171_vm3, %v170_v9, 49  ;;  %vm83_vm4 = vcmp.lt.s32.totalorder %v82_v10, 49  ;;  %v64_v17 = vld [vmem:[#allocation5 + $0x20] sm:$0xff]  ;;  %v65_v18 = vld [vmem:[#allocation5 + $0x28] sm:$0xff]  ;;  %v62_v21 = vld [vmem:[#allocation5 + $0x10] sm:$0xff] }
  0x13   :  { %128 = vmatpush.msra.mxu0 %v70_v7  ;;  %231 = vmatpush.msra.mxu3 %v71_v8  ;;  %v173_v14 = vperm.slane %v172_v13, 0  ;;  %v84_v19 = vsel %vm83_vm4, %v82_v10, 49  ;;  %v63_v22 = vld [vmem:[#allocation5 + $0x18] sm:$0xff]  ;;  %v60_v23 = vld [vmem:[#allocation5] sm:$0xff]  ;;  %v61_v24 = vld [vmem:[#allocation5 + $0x8] sm:$0xff]  ;;  %vm104_vm5 = vcmask 408576  }
  0x14   :  { %293 = vset.pattern.permute.xlu1 %v94_v2  ;;  %151 = vmatpush.msra.mxu1 %v71_v8  ;;  %v85_v20 = vperm.slane %v84_v19, 0  ;;  %v402_v28 = vmov 0.0   ;;  %v74_v35 = vld [vmem:[#allocation7] sm:$0xff]  ;;  %v75_v36 = vld [vmem:[#allocation7 + $0x8] sm:$0xff]  ;;  %v76_v45 = vld [vmem:[#allocation7 + $0x10] sm:$0xff]  ;;  %s403_s0 = smov [#allocation8]  }
  0x15   :  { %209 = vmatpush.msra.mxu2 %v68_v11  ;;  %129 = vmatpush.msra.mxu0 %v68_v11  ;;  %v77_v46 = vld [vmem:[#allocation7 + $0x18] sm:$0xff]  ;;  %s253_s2 = sshll.u32 %s403_s0, 4  ;;  %s255_s30 = sshll.u32 %s462_s3, 4  ;;  %s254_s2 = int_to_ptr.vmem [resolvable:$true] %s253_s2  ;;  %s256_s30 = int_to_ptr.hbm [resolvable:$true] %s255_s30 }
  0x16   :  { %232 = vmatpush.msra.mxu3 %v69_v12  ;;  %152 = vmatpush.msra.mxu1 %v69_v12 }
  0x17   :  { %210 = vmatpush.msra.mxu2 %v66_v15  ;;  %130 = vmatpush.msra.mxu0 %v66_v15 }
  0x18   :  { %233 = vmatpush.msra.mxu3 %v67_v16  ;;  %153 = vmatpush.msra.mxu1 %v67_v16 }
  0x19   :  { %211 = vmatpush.msra.mxu2 %v64_v17  ;;  %131 = vmatpush.msra.mxu0 %v64_v17 }
  0x1a   :  { %178 = vperm.xlu0 %292, %v173_v14   ;;  %234 = vmatpush.msra.mxu3 %v65_v18 }
  0x1b   :  { %154 = vmatpush.msra.mxu1 %v65_v18  ;;  %212 = vmatpush.msra.mxu2 %v62_v21 }
  0x1c   :  { %184 = vperm.xlu1 %293, %v173_v14   ;;  %235 = vmatpush.msra.mxu3 %v63_v22 }
  0x1d   :  { %132 = vmatpush.msra.mxu0 %v62_v21  ;;  %155 = vmatpush.msra.mxu1 %v63_v22 }
  0x1e   :  { %213 = vmatpush.msra.mxu2 %v60_v23  ;;  %236 = vmatpush.msra.mxu3 %v61_v24 }
  0x1f   :  { %133 = vmatpush.msra.mxu0 %v60_v23  ;;  %156 = vmatpush.msra.mxu1 %v61_v24 }
  0x22   :  { %90 = vperm.xlu0 %292, %v85_v20  }
  0x24   :  { %96 = vperm.xlu1 %293, %v85_v20  }
  0x2a   :  { %294 = vset.pattern.permute.xlu0 %v94_v2 }
  0x8c   :  { %v179_v26 = vpop.permute.xlu0 %178 }
  0x8d   :  { %vm186_vm6 = vcmp.eq.s32.totalorder %v179_v26, %v79_v25 }
  0x8e   :  { %v185_v27 = vpop.permute.xlu1 %184  ;;  %v277_v29 = vsel %vm186_vm6, 1.0, %v402_v28 }
  0x8f   :  { %280 = vmatmul.msk.f32.vlgmr.msra.gmra.mxu2 %vm104_vm5, %v277_v29  ;;  %283 = vmatmul.msk.f32.vlgmr.msra.gmra.mxu3 %vm104_vm5, %v277_v29  ;;  %vm187_vm7 = vcmp.eq.s32.totalorder %v185_v27, %v79_v25 }
  0x90   :  { %v278_v31 = vsel %vm187_vm7, 1.0, %v402_v28 }
  0x94   :  { %v91_v30 = vpop.permute.xlu0 %90 }
  0x95   :  { %vm98_vm8 = vcmp.eq.s32.totalorder %v91_v30, %v79_v25 }
  0x96   :  { %v269_v32 = vsel %vm98_vm8, 1.0, %v402_v28  ;;  %v97_v33 = vpop.permute.xlu1 %96 }
  0x97   :  { %272 = vmatmul.msk.f32.vlgmr.msra.gmra.mxu0 %vm104_vm5, %v269_v32  ;;  %275 = vmatmul.msk.f32.vlgmr.msra.gmra.mxu1 %vm104_vm5, %v269_v32  ;;  %vm99_vm9 = vcmp.eq.s32.totalorder %v97_v33, %v79_v25 }
  0x98   :  { %281 = vmatmul.msk.f32.gmra.mxu2 %vm104_vm5, %v278_v31  ;;  %284 = vmatmul.msk.f32.gmra.mxu3 %vm104_vm5, %v278_v31  ;;  %v270_v34 = vsel %vm99_vm9, 1.0, %v402_v28 }
  0x9f   :  { %273 = vmatmul.msk.f32.gmra.mxu0 %vm104_vm5, %v270_v34  ;;  %276 = vmatmul.msk.f32.gmra.mxu1 %vm104_vm5, %v270_v34 }
 0x112   :  { %v215_v37 = vpop.f32.mrf.mxu2  ;;  %v238_v38 = vpop.f32.mrf.mxu3 }
 0x113   :  { %v216_v39 = vadd.f32 %v215_v37, %v74_v35  ;;  %v239_v40 = vadd.f32 %v238_v38, %v75_v36 }
 0x114   :  { %v135_v41 = vpop.f32.mrf.mxu0  ;;  %v158_v42 = vpop.f32.mrf.mxu1 }
 0x115   :  { %245 = vst [vmem:[#allocation8 + $0x20] sm:$0xff] %v216_v39  ;;  %v136_v43 = vadd.f32 %v135_v41, %v74_v35  ;;  %v159_v44 = vadd.f32 %v158_v42, %v75_v36 }
 0x116   :  { %246 = vst [vmem:[#allocation8 + $0x28] sm:$0xff] %v239_v40 }
 0x117   :  { %164 = vst [vmem:[#allocation8] sm:$0xff] %v136_v43 }
 0x118   :  { %165 = vst [vmem:[#allocation8 + $0x8] sm:$0xff] %v159_v44 }
 0x11b   :  { %v218_v47 = vpop.f32.mrf.mxu2  ;;  %v241_v48 = vpop.f32.mrf.mxu3 }
 0x11c   :  { %v219_v49 = vadd.f32 %v218_v47, %v76_v45  ;;  %v242_v50 = vadd.f32 %v241_v48, %v77_v46  ;;  %v138_v51 = vpop.f32.mrf.mxu0  ;;  %v161_v52 = vpop.f32.mrf.mxu1 }
 0x11d   :  { %v139_v53 = vadd.f32 %v138_v51, %v76_v45  ;;  %v162_v54 = vadd.f32 %v161_v52, %v77_v46 }
 0x11e   :  { %247 = vst [vmem:[#allocation8 + $0x30] sm:$0xff] %v219_v49 }
 0x11f   :  { %248 = vst [vmem:[#allocation8 + $0x38] sm:$0xff] %v242_v50 }
 0x120   :  { %166 = vst [vmem:[#allocation8 + $0x10] sm:$0xff] %v139_v53 }
 0x121   :  { %167 = vst [vmem:[#allocation8 + $0x18] sm:$0xff] %v162_v54 }
 0x122   :  { %261 = dma.vmem_to_hbm [thread:$0]  %s254_s2, 1024, %s256_s30, [#allocation4], %s398_s20, %s398_s20, %s399_s21  }
 0x123   :  { %395 = dma.done.wait [#allocation4], 1024  }
 0x124   :  { %396 = vsyncadd [#allocation4], 4294966272 }
 0x125   :  { %266 = vsyncpa [#allocation3], 1 }
 0x126   :  { %267 = vsyncpa [#allocation6], 1 }
 0x127   :  { %268 = vsyncpa [#allocation4], 1 }

</bundles_post_ra>
